<compile_context>
chip_gen: v6e
topology: v6e:2x2x1
jax: 0.10.0
libtpu: 0.0.40
codegen_flags: <defaults>
</compile_context>

<pallas_src>
import functools

import jax
import jax.numpy as jnp
from jax import lax
from jax.experimental import pallas as pl
from jax.experimental.pallas import tpu as pltpu

_EPS = 1e-5


# ------------------- fused Conv3x3 + scale/bias + ReLU kernel -----------------
def _conv_kernel(x_ref, w_ref, s_ref, b_ref, o_ref, *, H, W, KH, KW, relu):
    """x_ref: (1, Hp, Wp, Cin) bf16 padded input (one sample).
    w_ref: (KH*KW, Cin, Ct) bf16 weights for this Cout tile.
    s_ref, b_ref: (1, Ct) f32 folded scale / bias.
    o_ref: (1, H*W, Ct) bf16 output tile."""
    cin = x_ref.shape[-1]
    ct = o_ref.shape[-1]
    acc = jnp.zeros((H * W, ct), jnp.float32)
    for di in range(KH):                       # 9 taps unrolled; taps accumulate
        for dj in range(KW):                   # in VMEM/vregs, never in HBM.
            a = x_ref[0, di:di + H, dj:dj + W, :].reshape(H * W, cin)
            acc = acc + jnp.dot(a, w_ref[di * KW + dj],
                                preferred_element_type=jnp.float32)
    y = acc * s_ref[0] + b_ref[0]              # folded BN / conv-bias epilogue
    if relu:
        y = jnp.maximum(y, 0.0)
    o_ref[0] = y.astype(o_ref.dtype)


def conv3x3_act(x, w, scale, bias, relu=True):
    """Fused Conv2d(3x3, stride=1, pad=1) + per-channel scale/bias + ReLU.

    x: [N,H,W,Cin] float, w: [3,3,Cin,Cout] f32, scale/bias: [Cout] f32.
    Returns [N,H,W,Cout] bf16 (activations stay bf16 between layers).
    """
    N, H, W, Cin = x.shape
    KH, KW, _, Cout = w.shape
    ph, pw = KH // 2, KW // 2
    xp = jnp.pad(x.astype(jnp.bfloat16), ((0, 0), (ph, ph), (pw, pw), (0, 0)))
    Hp, Wp = H + 2 * ph, W + 2 * pw
    wf = w.astype(jnp.bfloat16).reshape(KH * KW, Cin, Cout)
    s = scale.astype(jnp.float32).reshape(1, Cout)
    b = bias.astype(jnp.float32).reshape(1, Cout)

    taps = KH * KW
    ct = Cout if Cout <= 256 else 256          # full-dim block for small Cout

    # Explicit VMEM budget: double-buffered ins/outs + f32 accumulator + tap
    # slice scratch; clamped to v7x's 64 MiB physical VMEM.
    est = (2 * (Hp * Wp * Cin * 2 + taps * Cin * ct * 2 + 2 * ct * 4)
           + 2 * H * W * ct * 2 + H * W * ct * 4 + 2 * H * W * Cin * 2)
    vmem_limit = int(min(max(2 * est, 32 * 1024 * 1024), 64 * 1024 * 1024))

    kernel = functools.partial(_conv_kernel, H=H, W=W, KH=KH, KW=KW, relu=relu)
    out = pl.pallas_call(
        kernel,
        out_shape=jax.ShapeDtypeStruct((N, H * W, Cout), jnp.bfloat16),
        grid_spec=pltpu.PrefetchScalarGridSpec(
            num_scalar_prefetch=0,
            grid=(Cout // ct, N),              # weight tile outer (stays resident)
            in_specs=[
                pl.BlockSpec((1, Hp, Wp, Cin), lambda j, n: (n, 0, 0, 0)),
                pl.BlockSpec((taps, Cin, ct), lambda j, n: (0, 0, j)),
                pl.BlockSpec((1, ct), lambda j, n: (0, j)),
                pl.BlockSpec((1, ct), lambda j, n: (0, j)),
            ],
            out_specs=pl.BlockSpec((1, H * W, ct), lambda j, n: (n, 0, j)),
        ),
        compiler_params=pltpu.CompilerParams(
            dimension_semantics=("parallel", "parallel"),
            vmem_limit_bytes=vmem_limit),
    )(xp, wf, s, b)
    return out.reshape(N, H, W, Cout)          # free metadata reshape in HBM


# ------------------------------- max pooling ----------------------------------
def _maxpool2x2(x):
    # TODO(synk): 2x2/2 max-pool left as XLA strided-slice glue (mem-bound either
    # way), not a dedicated Pallas kernel.
    N, H, W, C = x.shape
    x = x[:, :(H // 2) * 2, :(W // 2) * 2, :]
    a = jnp.maximum(x[:, 0::2, 0::2, :], x[:, 0::2, 1::2, :])
    b = jnp.maximum(x[:, 1::2, 0::2, :], x[:, 1::2, 1::2, :])
    return jnp.maximum(a, b)


# ------------------------------- forward pass ---------------------------------
def _vgg_forward(params, x_nchw):
    x = jnp.transpose(x_nchw.astype(jnp.float32), (0, 2, 3, 1))   # NCHW -> NHWC
    x = x.astype(jnp.bfloat16)
    outs = []
    for stage in params:                        # body1..body4
        for op in stage:
            if op is None:                      # 'M' = MaxPool2d(2, 2)
                x = _maxpool2x2(x)
            else:                               # fused conv + bn + relu
                x = conv3x3_act(x, op["w"], op["s"], op["b"], relu=True)
        outs.append(jnp.transpose(x, (0, 3, 1, 2)).astype(jnp.float32))
    return outs                                 # [body1, body2, body3, body4]


# --------------------------------- module -------------------------------------
_VGG16_STAGES = (
    (64, 64, "M", 128, 128),       # body1  (features[:13] of vgg16_bn)
    ("M", 256, 256, 256),          # body2  (features[13:23])
    ("M", 512, 512, 512),          # body3  (features[23:33])
    ("M", 512, 512, 512),          # body4  (features[33:43], +'M' if last_pool)
)


class BaseVGGPallas:
    """Base_VGG forward in Pallas: returns [body1, body2, body3, body4] NCHW
    feature maps. Deterministic synthetic weights (He-normal convs, identity
    BN running stats) stand in for the pretrained torchvision weights."""

    def __init__(self, name="vgg16_bn", last_pool=False, num_channels=256, seed=0):
        assert name in ("vgg16_bn", "vgg16"), name
        self.name = name
        self.batch_norm = (name == "vgg16_bn")
        self.last_pool = last_pool
        self.num_channels = num_channels

        key = jax.random.PRNGKey(seed)
        params, outplanes = [], []
        cin, idx = 3, 0
        for stage_cfg in _VGG16_STAGES:
            stage = []
            for v in stage_cfg:
                if v == "M":
                    stage.append(None)
                    continue
                cout = int(v)
                idx += 1
                k = jax.random.fold_in(key, idx)
                w = (jax.random.normal(k, (3, 3, cin, cout), jnp.float32)
                     * (2.0 / (9.0 * cin)) ** 0.5)
                conv_b = jnp.zeros((cout,), jnp.float32)
                if self.batch_norm:
                    gamma = jnp.ones((cout,), jnp.float32)
                    beta = jnp.zeros((cout,), jnp.float32)
                    rmean = jnp.zeros((cout,), jnp.float32)
                    rvar = jnp.ones((cout,), jnp.float32)
                    scale = gamma * lax.rsqrt(rvar + _EPS)
                    bias = beta + scale * (conv_b - rmean)
                else:
                    scale = jnp.ones((cout,), jnp.float32)
                    bias = conv_b
                stage.append({"w": w, "s": scale, "b": bias})
                cin = cout
            outplanes.append(cin)
            params.append(stage)
        if last_pool:
            params[-1].append(None)
        self.params = params
        self._outplanes = outplanes
        self._fwd = jax.jit(_vgg_forward)

    def get_outplanes(self):
        return list(self._outplanes)            # [128, 256, 512, 512]

    def __call__(self, x_nchw):
        return self._fwd(self.params, x_nchw)


# ----------------------------------- main --------------------------------------
if __name__ == "__main__":
    key = jax.random.PRNGKey(0)

    # Rigor check: one fused conv layer vs a pure-JAX reference at bf16 precision.
    kx, kw = jax.random.fold_in(key, 1001), jax.random.fold_in(key, 1002)
    xt = jax.random.normal(kx, (1, 8, 8, 16), jnp.float32)
    wt = jax.random.normal(kw, (3, 3, 16, 32), jnp.float32) * 0.2
    st = jnp.linspace(0.5, 1.5, 32, dtype=jnp.float32)
    bt = jnp.linspace(-0.2, 0.2, 32, dtype=jnp.float32)
    got = conv3x3_act(xt, wt, st, bt, relu=True).astype(jnp.float32)
    ref = lax.conv_general_dilated(
        xt.astype(jnp.bfloat16).astype(jnp.float32),
        wt.astype(jnp.bfloat16).astype(jnp.float32),
        window_strides=(1, 1), padding="SAME",
        dimension_numbers=("NHWC", "HWIO", "NHWC"),
        precision=lax.Precision.HIGHEST)
    ref = jnp.maximum(ref * st + bt, 0.0).astype(jnp.bfloat16).astype(jnp.float32)
    assert jnp.allclose(got, ref, rtol=0.05, atol=0.05), float(
        jnp.max(jnp.abs(got - ref)))

    # Full Base_VGG forward.
    x = jax.random.normal(jax.random.fold_in(key, 7), (2, 3, 32, 32), jnp.float32)
    model = BaseVGGPallas("vgg16_bn", last_pool=False, num_channels=256, seed=0)
    feats = model(x)
    for f in feats:
        jax.block_until_ready(f)
    shapes = [tuple(f.shape) for f in feats]
    assert shapes == [(2, 128, 16, 16), (2, 256, 8, 8),
                      (2, 512, 4, 4), (2, 512, 2, 2)], shapes
    assert model.get_outplanes() == [128, 256, 512, 512]
    print("KERNEL_OK")
</pallas_src>

<mosaic_0001>
module attributes {stable_mosaic.version = 11 : i64} {
  func.func @_conv_kernel(%arg0: i32, %arg1: i32, %arg2: memref<1x10x10x16xbf16, #tpu.memory_space<vmem>>, %arg3: memref<9x16x32xbf16, #tpu.memory_space<vmem>>, %arg4: memref<1x32xf32, #tpu.memory_space<vmem>>, %arg5: memref<1x32xf32, #tpu.memory_space<vmem>>, %arg6: memref<1x64x32xbf16, #tpu.memory_space<vmem>>) attributes {dimension_semantics = [#tpu.dimension_semantics<parallel>, #tpu.dimension_semantics<parallel>], iteration_bounds = array<i64: 1, 1>, scalar_prefetch = 0 : i64, scratch_operands = 0 : i64, tpu.core_type = #tpu.core_type<tc>, window_params = [{transform_indices = @transform_0, window_bounds = array<i64: 1, 10, 10, 16>}, {transform_indices = @transform_1, window_bounds = array<i64: 9, 16, 32>}, {transform_indices = @transform_2, window_bounds = array<i64: 1, 32>}, {transform_indices = @transform_3, window_bounds = array<i64: 1, 32>}, {transform_indices = @transform_4, window_bounds = array<i64: 1, 64, 32>}]} {
    %cst = arith.constant 0.000000e+00 : f32
    %0 = vector.broadcast %cst : f32 to vector<64x32xf32>
    %c0 = arith.constant 0 : index
    %c0_0 = arith.constant 0 : index
    %c0_1 = arith.constant 0 : index
    %c0_2 = arith.constant 0 : index
    %1 = vector.load %arg2[%c0, %c0_0, %c0_1, %c0_2] : memref<1x10x10x16xbf16, #tpu.memory_space<vmem>>, vector<1x8x8x16xbf16>
    %2 = vector.shape_cast %1 : vector<1x8x8x16xbf16> to vector<8x8x16xbf16>
    %3 = vector.shape_cast %2 : vector<8x8x16xbf16> to vector<64x16xbf16>
    %c0_3 = arith.constant 0 : index
    %c0_4 = arith.constant 0 : index
    %c0_5 = arith.constant 0 : index
    %4 = vector.load %arg3[%c0_3, %c0_4, %c0_5] : memref<9x16x32xbf16, #tpu.memory_space<vmem>>, vector<1x16x32xbf16>
    %5 = vector.shape_cast %4 : vector<1x16x32xbf16> to vector<16x32xbf16>
    %cst_6 = arith.constant dense<0.000000e+00> : vector<64x32xf32>
    %6 = tpu.matmul %3, %5, %cst_6 {dimension_numbers = #tpu.dot_dimension_numbers<[1], [0], [0], [1], [0, 0, 1, 1], [], []>} : vector<64x16xbf16>, vector<16x32xbf16>, vector<64x32xf32> -> vector<64x32xf32>
    %7 = arith.addf %0, %6 : vector<64x32xf32>
    %c0_7 = arith.constant 0 : index
    %c0_8 = arith.constant 0 : index
    %c1 = arith.constant 1 : index
    %c0_9 = arith.constant 0 : index
    %8 = vector.load %arg2[%c0_7, %c0_8, %c1, %c0_9] : memref<1x10x10x16xbf16, #tpu.memory_space<vmem>>, vector<1x8x8x16xbf16>
    %9 = vector.shape_cast %8 : vector<1x8x8x16xbf16> to vector<8x8x16xbf16>
    %10 = vector.shape_cast %9 : vector<8x8x16xbf16> to vector<64x16xbf16>
    %c1_10 = arith.constant 1 : index
    %c0_11 = arith.constant 0 : index
    %c0_12 = arith.constant 0 : index
    %11 = vector.load %arg3[%c1_10, %c0_11, %c0_12] : memref<9x16x32xbf16, #tpu.memory_space<vmem>>, vector<1x16x32xbf16>
    %12 = vector.shape_cast %11 : vector<1x16x32xbf16> to vector<16x32xbf16>
    %cst_13 = arith.constant dense<0.000000e+00> : vector<64x32xf32>
    %13 = tpu.matmul %10, %12, %cst_13 {dimension_numbers = #tpu.dot_dimension_numbers<[1], [0], [0], [1], [0, 0, 1, 1], [], []>} : vector<64x16xbf16>, vector<16x32xbf16>, vector<64x32xf32> -> vector<64x32xf32>
    %14 = arith.addf %7, %13 : vector<64x32xf32>
    %c0_14 = arith.constant 0 : index
    %c0_15 = arith.constant 0 : index
    %c2 = arith.constant 2 : index
    %c0_16 = arith.constant 0 : index
    %15 = vector.load %arg2[%c0_14, %c0_15, %c2, %c0_16] : memref<1x10x10x16xbf16, #tpu.memory_space<vmem>>, vector<1x8x8x16xbf16>
    %16 = vector.shape_cast %15 : vector<1x8x8x16xbf16> to vector<8x8x16xbf16>
    %17 = vector.shape_cast %16 : vector<8x8x16xbf16> to vector<64x16xbf16>
    %c2_17 = arith.constant 2 : index
    %c0_18 = arith.constant 0 : index
    %c0_19 = arith.constant 0 : index
    %18 = vector.load %arg3[%c2_17, %c0_18, %c0_19] : memref<9x16x32xbf16, #tpu.memory_space<vmem>>, vector<1x16x32xbf16>
    %19 = vector.shape_cast %18 : vector<1x16x32xbf16> to vector<16x32xbf16>
    %cst_20 = arith.constant dense<0.000000e+00> : vector<64x32xf32>
    %20 = tpu.matmul %17, %19, %cst_20 {dimension_numbers = #tpu.dot_dimension_numbers<[1], [0], [0], [1], [0, 0, 1, 1], [], []>} : vector<64x16xbf16>, vector<16x32xbf16>, vector<64x32xf32> -> vector<64x32xf32>
    %21 = arith.addf %14, %20 : vector<64x32xf32>
    %c0_21 = arith.constant 0 : index
    %c1_22 = arith.constant 1 : index
    %c0_23 = arith.constant 0 : index
    %c0_24 = arith.constant 0 : index
    %22 = vector.load %arg2[%c0_21, %c1_22, %c0_23, %c0_24] : memref<1x10x10x16xbf16, #tpu.memory_space<vmem>>, vector<1x8x8x16xbf16>
    %23 = vector.shape_cast %22 : vector<1x8x8x16xbf16> to vector<8x8x16xbf16>
    %24 = vector.shape_cast %23 : vector<8x8x16xbf16> to vector<64x16xbf16>
    %c3 = arith.constant 3 : index
    %c0_25 = arith.constant 0 : index
    %c0_26 = arith.constant 0 : index
    %25 = vector.load %arg3[%c3, %c0_25, %c0_26] : memref<9x16x32xbf16, #tpu.memory_space<vmem>>, vector<1x16x32xbf16>
    %26 = vector.shape_cast %25 : vector<1x16x32xbf16> to vector<16x32xbf16>
    %cst_27 = arith.constant dense<0.000000e+00> : vector<64x32xf32>
    %27 = tpu.matmul %24, %26, %cst_27 {dimension_numbers = #tpu.dot_dimension_numbers<[1], [0], [0], [1], [0, 0, 1, 1], [], []>} : vector<64x16xbf16>, vector<16x32xbf16>, vector<64x32xf32> -> vector<64x32xf32>
    %28 = arith.addf %21, %27 : vector<64x32xf32>
    %c0_28 = arith.constant 0 : index
    %c1_29 = arith.constant 1 : index
    %c1_30 = arith.constant 1 : index
    %c0_31 = arith.constant 0 : index
    %29 = vector.load %arg2[%c0_28, %c1_29, %c1_30, %c0_31] : memref<1x10x10x16xbf16, #tpu.memory_space<vmem>>, vector<1x8x8x16xbf16>
    %30 = vector.shape_cast %29 : vector<1x8x8x16xbf16> to vector<8x8x16xbf16>
    %31 = vector.shape_cast %30 : vector<8x8x16xbf16> to vector<64x16xbf16>
    %c4 = arith.constant 4 : index
    %c0_32 = arith.constant 0 : index
    %c0_33 = arith.constant 0 : index
    %32 = vector.load %arg3[%c4, %c0_32, %c0_33] : memref<9x16x32xbf16, #tpu.memory_space<vmem>>, vector<1x16x32xbf16>
    %33 = vector.shape_cast %32 : vector<1x16x32xbf16> to vector<16x32xbf16>
    %cst_34 = arith.constant dense<0.000000e+00> : vector<64x32xf32>
    %34 = tpu.matmul %31, %33, %cst_34 {dimension_numbers = #tpu.dot_dimension_numbers<[1], [0], [0], [1], [0, 0, 1, 1], [], []>} : vector<64x16xbf16>, vector<16x32xbf16>, vector<64x32xf32> -> vector<64x32xf32>
    %35 = arith.addf %28, %34 : vector<64x32xf32>
    %c0_35 = arith.constant 0 : index
    %c1_36 = arith.constant 1 : index
    %c2_37 = arith.constant 2 : index
    %c0_38 = arith.constant 0 : index
    %36 = vector.load %arg2[%c0_35, %c1_36, %c2_37, %c0_38] : memref<1x10x10x16xbf16, #tpu.memory_space<vmem>>, vector<1x8x8x16xbf16>
    %37 = vector.shape_cast %36 : vector<1x8x8x16xbf16> to vector<8x8x16xbf16>
    %38 = vector.shape_cast %37 : vector<8x8x16xbf16> to vector<64x16xbf16>
    %c5 = arith.constant 5 : index
    %c0_39 = arith.constant 0 : index
    %c0_40 = arith.constant 0 : index
    %39 = vector.load %arg3[%c5, %c0_39, %c0_40] : memref<9x16x32xbf16, #tpu.memory_space<vmem>>, vector<1x16x32xbf16>
    %40 = vector.shape_cast %39 : vector<1x16x32xbf16> to vector<16x32xbf16>
    %cst_41 = arith.constant dense<0.000000e+00> : vector<64x32xf32>
    %41 = tpu.matmul %38, %40, %cst_41 {dimension_numbers = #tpu.dot_dimension_numbers<[1], [0], [0], [1], [0, 0, 1, 1], [], []>} : vector<64x16xbf16>, vector<16x32xbf16>, vector<64x32xf32> -> vector<64x32xf32>
    %42 = arith.addf %35, %41 : vector<64x32xf32>
    %c0_42 = arith.constant 0 : index
    %c2_43 = arith.constant 2 : index
    %c0_44 = arith.constant 0 : index
    %c0_45 = arith.constant 0 : index
    %43 = vector.load %arg2[%c0_42, %c2_43, %c0_44, %c0_45] : memref<1x10x10x16xbf16, #tpu.memory_space<vmem>>, vector<1x8x8x16xbf16>
    %44 = vector.shape_cast %43 : vector<1x8x8x16xbf16> to vector<8x8x16xbf16>
    %45 = vector.shape_cast %44 : vector<8x8x16xbf16> to vector<64x16xbf16>
    %c6 = arith.constant 6 : index
    %c0_46 = arith.constant 0 : index
    %c0_47 = arith.constant 0 : index
    %46 = vector.load %arg3[%c6, %c0_46, %c0_47] : memref<9x16x32xbf16, #tpu.memory_space<vmem>>, vector<1x16x32xbf16>
    %47 = vector.shape_cast %46 : vector<1x16x32xbf16> to vector<16x32xbf16>
    %cst_48 = arith.constant dense<0.000000e+00> : vector<64x32xf32>
    %48 = tpu.matmul %45, %47, %cst_48 {dimension_numbers = #tpu.dot_dimension_numbers<[1], [0], [0], [1], [0, 0, 1, 1], [], []>} : vector<64x16xbf16>, vector<16x32xbf16>, vector<64x32xf32> -> vector<64x32xf32>
    %49 = arith.addf %42, %48 : vector<64x32xf32>
    %c0_49 = arith.constant 0 : index
    %c2_50 = arith.constant 2 : index
    %c1_51 = arith.constant 1 : index
    %c0_52 = arith.constant 0 : index
    %50 = vector.load %arg2[%c0_49, %c2_50, %c1_51, %c0_52] : memref<1x10x10x16xbf16, #tpu.memory_space<vmem>>, vector<1x8x8x16xbf16>
    %51 = vector.shape_cast %50 : vector<1x8x8x16xbf16> to vector<8x8x16xbf16>
    %52 = vector.shape_cast %51 : vector<8x8x16xbf16> to vector<64x16xbf16>
    %c7 = arith.constant 7 : index
    %c0_53 = arith.constant 0 : index
    %c0_54 = arith.constant 0 : index
    %53 = vector.load %arg3[%c7, %c0_53, %c0_54] : memref<9x16x32xbf16, #tpu.memory_space<vmem>>, vector<1x16x32xbf16>
    %54 = vector.shape_cast %53 : vector<1x16x32xbf16> to vector<16x32xbf16>
    %cst_55 = arith.constant dense<0.000000e+00> : vector<64x32xf32>
    %55 = tpu.matmul %52, %54, %cst_55 {dimension_numbers = #tpu.dot_dimension_numbers<[1], [0], [0], [1], [0, 0, 1, 1], [], []>} : vector<64x16xbf16>, vector<16x32xbf16>, vector<64x32xf32> -> vector<64x32xf32>
    %56 = arith.addf %49, %55 : vector<64x32xf32>
    %c0_56 = arith.constant 0 : index
    %c2_57 = arith.constant 2 : index
    %c2_58 = arith.constant 2 : index
    %c0_59 = arith.constant 0 : index
    %57 = vector.load %arg2[%c0_56, %c2_57, %c2_58, %c0_59] : memref<1x10x10x16xbf16, #tpu.memory_space<vmem>>, vector<1x8x8x16xbf16>
    %58 = vector.shape_cast %57 : vector<1x8x8x16xbf16> to vector<8x8x16xbf16>
    %59 = vector.shape_cast %58 : vector<8x8x16xbf16> to vector<64x16xbf16>
    %c8 = arith.constant 8 : index
    %c0_60 = arith.constant 0 : index
    %c0_61 = arith.constant 0 : index
    %60 = vector.load %arg3[%c8, %c0_60, %c0_61] : memref<9x16x32xbf16, #tpu.memory_space<vmem>>, vector<1x16x32xbf16>
    %61 = vector.shape_cast %60 : vector<1x16x32xbf16> to vector<16x32xbf16>
    %cst_62 = arith.constant dense<0.000000e+00> : vector<64x32xf32>
    %62 = tpu.matmul %59, %61, %cst_62 {dimension_numbers = #tpu.dot_dimension_numbers<[1], [0], [0], [1], [0, 0, 1, 1], [], []>} : vector<64x16xbf16>, vector<16x32xbf16>, vector<64x32xf32> -> vector<64x32xf32>
    %63 = arith.addf %56, %62 : vector<64x32xf32>
    %c0_63 = arith.constant 0 : index
    %c0_64 = arith.constant 0 : index
    %64 = vector.load %arg4[%c0_63, %c0_64] : memref<1x32xf32, #tpu.memory_space<vmem>>, vector<1x32xf32>
    %65 = vector.shape_cast %64 : vector<1x32xf32> to vector<32xf32>
    %66 = vector.shape_cast %65 : vector<32xf32> to vector<1x32xf32>
    %67 = vector.broadcast %66 : vector<1x32xf32> to vector<64x32xf32>
    %68 = arith.mulf %63, %67 : vector<64x32xf32>
    %c0_65 = arith.constant 0 : index
    %c0_66 = arith.constant 0 : index
    %69 = vector.load %arg5[%c0_65, %c0_66] : memref<1x32xf32, #tpu.memory_space<vmem>>, vector<1x32xf32>
    %70 = vector.shape_cast %69 : vector<1x32xf32> to vector<32xf32>
    %71 = vector.shape_cast %70 : vector<32xf32> to vector<1x32xf32>
    %72 = vector.broadcast %71 : vector<1x32xf32> to vector<64x32xf32>
    %73 = arith.addf %68, %72 : vector<64x32xf32>
    %cst_67 = arith.constant 0.000000e+00 : f32
    %74 = vector.broadcast %cst_67 : f32 to vector<64x32xf32>
    %75 = arith.maximumf %73, %74 : vector<64x32xf32>
    %76 = arith.truncf %75 : vector<64x32xf32> to vector<64x32xbf16>
    %c0_68 = arith.constant 0 : index
    %c0_69 = arith.constant 0 : index
    %c0_70 = arith.constant 0 : index
    %77 = vector.load %arg6[%c0_68, %c0_69, %c0_70] : memref<1x64x32xbf16, #tpu.memory_space<vmem>>, vector<1x64x32xbf16>
    %78 = vector.shape_cast %77 : vector<1x64x32xbf16> to vector<64x32xbf16>
    %79 = vector.shape_cast %76 : vector<64x32xbf16> to vector<1x64x32xbf16>
    tpu.vector_store %arg6[%c0_68, %c0_69, %c0_70], %79 {strides = array<i32>} : memref<1x64x32xbf16, #tpu.memory_space<vmem>>, vector<1x64x32xbf16>,
    return
  }
  func.func @transform_0(%arg0: i32, %arg1: i32) -> (i32, i32, i32, i32) {
    %c0_i32 = arith.constant 0 : i32
    %c0_i32_0 = arith.constant 0 : i32
    %c0_i32_1 = arith.constant 0 : i32
    %c0_i32_2 = arith.constant 0 : i32
    return %arg1, %c0_i32, %c0_i32_0, %c0_i32_1 : i32, i32, i32, i32
  }
  func.func @transform_1(%arg0: i32, %arg1: i32) -> (i32, i32, i32) {
    %c0_i32 = arith.constant 0 : i32
    %c0_i32_0 = arith.constant 0 : i32
    %c0_i32_1 = arith.constant 0 : i32
    return %c0_i32, %c0_i32_0, %arg0 : i32, i32, i32
  }
  func.func @transform_2(%arg0: i32, %arg1: i32) -> (i32, i32) {
    %c0_i32 = arith.constant 0 : i32
    %c0_i32_0 = arith.constant 0 : i32
    return %c0_i32, %arg0 : i32, i32
  }
  func.func @transform_3(%arg0: i32, %arg1: i32) -> (i32, i32) {
    %c0_i32 = arith.constant 0 : i32
    %c0_i32_0 = arith.constant 0 : i32
    return %c0_i32, %arg0 : i32, i32
  }
  func.func @transform_4(%arg0: i32, %arg1: i32) -> (i32, i32, i32) {
    %c0_i32 = arith.constant 0 : i32
    %c0_i32_0 = arith.constant 0 : i32
    return %arg1, %c0_i32, %arg0 : i32, i32, i32
  }
}

</mosaic_0001>

<bundles_post_ra>
// kernel: tpu_custom_call.1
= control target key start
LH: loop header
LB: loop body
LE: loop exit
PB: predicated region body
PF: predicated region fallthrough
CT: control target
= control target key end

     0   :  { %9 = vsyncpa [#allocation3], 0  ;;  %s2435_s0 = inlined_call_operand.hbm [shape: bf16[1,10,10,16], index: 0, kind: input, shape index: {}]   ;;  %s2436_s1 = inlined_call_operand.hbm [shape: bf16[9,16,32], index: 1, kind: input, shape index: {}]   ;;  %s2437_s2 = inlined_call_operand.vmem [shape: f32[1,32], index: 2, kind: input, shape index: {}]   ;;  %s2438_s3 = inlined_call_operand.vmem [shape: f32[1,32], index: 3, kind: input, shape index: {}]   ;;  %s2439_s4 = inlined_call_operand.vmem [shape: bf16[1,64,32], index: 4, kind: output, shape index: {}]  }
   0x1   :  { %10 = vsyncpa [#allocation5], 0  ;;  %s1998_s15 = smov [#allocation2]  }
   0x2   :  { %s16_s16 = sshll.u32 %s1998_s15, 4  ;;  %s17_s16 = int_to_ptr.vmem [resolvable:$true] %s16_s16 }
   0x3   :  { %s1962_s17 = scalar_lea.vmem %s17_s16, 1280  ;;  %p1967_p1 = scmp.lt.s32.totalorder %s17_s16, %s17_s16 }
   0x4   :  { %p1963_p0 = scmp.ne.s32.totalorder %s17_s16, %s1962_s17  ;;  %p1968_p2 = scmp.lt.s32.totalorder %s1962_s17, %s1962_s17 }
   0x6   :  { %p1969_p3 = por %p1968_p2, %p1967_p1 }
   0x8   :  { %p1970_p4 = pnand %p1969_p3, %p1963_p0 }
   0xa   :  { %1973 = shalt.err (!%p1970_p4)
}
   0xb   :  { %s1999_s18 = smov 64   ;;  %s2000_s19 = smov 4  }
   0xc   :  { %22 = dma.hbm_to_vmem [thread:$0]  %s2435_s0, 1280, %s17_s16, [#allocation3], %s1999_s18, %s1999_s18, %s2000_s19  }
   0xd   :  { %s2001_s22 = smov [#allocation4]  }
   0xe   :  { %s28_s23 = sshll.u32 %s2001_s22, 4  ;;  %s29_s23 = int_to_ptr.vmem [resolvable:$true] %s28_s23 }
   0xf   :  { %s1982_s24 = scalar_lea.vmem %s29_s23, 1152  ;;  %p1987_p6 = scmp.lt.s32.totalorder %s29_s23, %s29_s23 }
  0x10   :  { %p1983_p5 = scmp.ne.s32.totalorder %s29_s23, %s1982_s24  ;;  %p1988_p7 = scmp.lt.s32.totalorder %s1982_s24, %s1982_s24 }
  0x12   :  { %p1989_p8 = por %p1988_p7, %p1987_p6 }
  0x14   :  { %p1990_p9 = pnand %p1989_p8, %p1983_p5 }
  0x16   :  { %1993 = shalt.err (!%p1990_p9)
}
  0x17   :  { %34 = dma.hbm_to_vmem [thread:$0]  %s2436_s1, 1152, %s29_s23, [#allocation5], %s1999_s18, %s1999_s18, %s2000_s19  }
  0x18   :  { %1994 = dma.done.wait [#allocation3], 1280  }
  0x19   :  { %1995 = vsyncadd [#allocation3], 4294966016 }
  0x1a   :  { %1996 = dma.done.wait [#allocation5], 1152  }
  0x1b   :  { %1997 = vsyncadd [#allocation5], 4294966144  ;;  %vm64_vm0 = vsmask.f32 3328  ;;  %vm65_vm1 = vsmask.f32 7440 }
  0x1c   :  { %v1933_v0 = vld [vmem:[#allocation4 + $0x8] sm:$0xff]   ;;  %v2033_v1 = vld [vmem:[#allocation2] sm:$0xf]  ;;  %v2035_v2 = vld [vmem:[#allocation2 + $0x8] sm:$0xf]  ;;  %vm200_vm2 = vcmask 130048  }
  0x1d   :  { %v2037_v3 = vld [vmem:[#allocation2 + $0x4] sm:$0x1]  ;;  %1927 = vmatprep.subr.bf16.mxu1 %v1933_v0  ;;  %1837 = vmatprep.subr.bf16.mxu0 %v1933_v0  ;;  %v2039_v4 = vld [vmem:[#allocation2 + $0xc] sm:$0x1]  ;;  %v68_v5 = vshrl.u32 %v2033_v1, 16  ;;  %v71_v6 = vshll.u32 %v2033_v1, 16  ;;  %vm2064_vm3 = vmor %vm64_vm0, %vm65_vm1 }
  0x1e   :  { %v77_v7 = vshll.u32 %v2037_v3, 16  ;;  %v82_v8 = vshrl.u32 %v2035_v2, 16  ;;  %1928 = vmatpush3.bf16.msra.mxu1 %v1933_v0  ;;  %1838 = vmatpush3.bf16.msra.mxu0 %v1933_v0  ;;  %v85_v9 = vshll.u32 %v2035_v2, 16  ;;  %v91_v10 = vshll.u32 %v2039_v4, 16  ;;  %v2049_v13 = vld [vmem:[#allocation2 + $0x20] sm:$0xf] }
  0x1f   :  { %v410_v11 = vrot.slane %v2037_v3, 5  ;;  %v414_v12 = vrot.slane %v2039_v4, 5  ;;  %v70_v14 = vrot.slane %v68_v5, 4  ;;  %v73_v15 = vrot.slane %v71_v6, 5  ;;  %v2051_v18 = vld [vmem:[#allocation2 + $0x28] sm:$0xf] }
  0x20   :  { %v79_v16 = vrot.slane %v77_v7, 5  ;;  %v84_v17 = vrot.slane %v82_v8, 4  ;;  %v87_v19 = vrot.slane %v85_v9, 5  ;;  %v93_v20 = vrot.slane %v91_v10, 5  ;;  %v2053_v21 = vld [vmem:[#allocation2 + $0x24] sm:$0x1] }
  0x21   :  { %v2055_v22 = vld [vmem:[#allocation2 + $0x2c] sm:$0x1]  ;;  %v74_v23 = vor.u32 %v73_v15, %v70_v14  ;;  %v124_v24 = vshrl.u32 %v2049_v13, 16  ;;  %v127_v25 = vshll.u32 %v2049_v13, 16  ;;  %v133_v26 = vshll.u32 %v2053_v21, 16  ;;  %v2060_v27 = vld [vmem:[#allocation4] sm:$0xff]  }
  0x22   :  { %v88_v29 = vor.u32 %v87_v19, %v84_v17  ;;  %v138_v30 = vshrl.u32 %v2051_v18, 16  ;;  %v141_v31 = vshll.u32 %v2051_v18, 16  ;;  %v147_v32 = vshll.u32 %v2055_v22, 16  ;;  %v2071_v33 = vld [vmem:[#allocation4 + $0x10] sm:$0xff]   ;;  %1847 = vmatprep.subr.bf16.mxu1 %v2060_v27  ;;  %v2074_v38 = vld [vmem:[#allocation2 + $0x10] sm:$0xf] }
  0x23   :  { %v75_v34 = vrot.slane %v74_v23, 4  ;;  %v126_v35 = vrot.slane %v124_v24, 4  ;;  %v129_v36 = vrot.slane %v127_v25, 5  ;;  %v135_v37 = vrot.slane %v133_v26, 5  ;;  %v2076_v43 = vld [vmem:[#allocation2 + $0x18] sm:$0xf]  ;;  %1857 = vmatprep.subr.bf16.mxu0 %v2071_v33 }
  0x24   :  { %vm405_vm4 = vcmask 1042432   ;;  %vm406_vm5 = vcmask 1046532   ;;  %v89_v39 = vrot.slane %v88_v29, 4  ;;  %v140_v40 = vrot.slane %v138_v30, 4  ;;  %v2083_v48 = vld [vmem:[#allocation2 + $0x14] sm:$0x1] }
  0x25   :  { %v143_v41 = vrot.slane %v141_v31, 5  ;;  %v149_v42 = vrot.slane %v147_v32, 5  ;;  %v80_v44 = vsel %vm2064_vm3, %v75_v34, %v79_v16  ;;  %v130_v45 = vor.u32 %v129_v36, %v126_v35  ;;  %v2087_v51 = vld [vmem:[#allocation2 + $0x1c] sm:$0x1]  ;;  %v2093_v58 = vld [vmem:[#allocation2 + $0x30] sm:$0xf]  ;;  %vm2121_vm6 = vmor %vm405_vm4, %vm406_vm5 }
  0x26   :  { %v426_v46 = vrot.slane %v2053_v21, 5  ;;  %v430_v47 = vrot.slane %v2055_v22, 5  ;;  %v94_v49 = vsel %vm2064_vm3, %v89_v39, %v93_v20  ;;  %v96_v52 = vshrl.u32 %v2074_v38, 16  ;;  %v2096_v63 = vld [vmem:[#allocation2 + $0x38] sm:$0xf] }
  0x27   :  { %v144_v50 = vor.u32 %v143_v41, %v140_v40  ;;  %v99_v53 = vshll.u32 %v2074_v38, 16  ;;  %v1669_v54 = vcombine.low %v80_v44, %v94_v49  ;;  %v131_v55 = vrot.slane %v130_v45, 4  ;;  %v2098_v0 = vld [vmem:[#allocation2 + $0x34] sm:$0x1]  ;;  %v2107_v16 = vld [vmem:[#allocation2 + $0x3c] sm:$0x1] }
  0x28   :  { %v105_v56 = vshll.u32 %v2083_v48, 16  ;;  %v110_v57 = vshrl.u32 %v2076_v43, 16  ;;  %v98_v60 = vrot.slane %v96_v52, 4  ;;  %v113_v62 = vshll.u32 %v2076_v43, 16  ;;  %v381_v23 = vld [vmem:[#allocation2] sm:$0xe] }
  0x29   :  { %v145_v59 = vrot.slane %v144_v50, 4  ;;  %v101_v61 = vrot.slane %v99_v53, 5  ;;  %1839 = vmatprep.mubr.msk.bf16.mxu0 %vm200_vm2, %v1669_v54  ;;  %v136_v5 = vsel %vm2064_vm3, %v131_v55, %v135_v37  ;;  %v119_v8 = vshll.u32 %v2087_v51, 16  ;;  %v382_v24 = vld [vmem:[#allocation2 + $0x8] sm:$0xe] }
  0x2a   :  { %v107_v6 = vrot.slane %v105_v56, 5  ;;  %v112_v7 = vrot.slane %v110_v57, 4  ;;  %v115_v14 = vrot.slane %v113_v62, 5  ;;  %v418_v15 = vrot.slane %v2083_v48, 5  ;;  %v384_v50 = vld [vmem:[#allocation2 + $0x18] sm:$0xe] }
  0x2b   :  { %v150_v9 = vsel %vm2064_vm3, %v145_v59, %v149_v42  ;;  %v102_v10 = vor.u32 %v101_v61, %v98_v60  ;;  %v121_v19 = vrot.slane %v119_v8, 5  ;;  %v152_v20 = vshrl.u32 %v2093_v58, 16  ;;  %v383_v42 = vld [vmem:[#allocation2 + $0x10] sm:$0xe]  ;;  %v385_v61 = vld [vmem:[#allocation2 + $0x20] sm:$0xe] }
  0x2c   :  { %v1671_v17 = vcombine.low %v136_v5, %v150_v9  ;;  %v116_v26 = vor.u32 %v115_v14, %v112_v7  ;;  %v155_v29 = vshll.u32 %v2093_v58, 16  ;;  %v161_v30 = vshll.u32 %v2098_v0, 16  ;;  %v1939_v60 = vld [vmem:[#allocation4 + $0x20] sm:$0xff]   ;;  %v386_v62 = vld [vmem:[#allocation2 + $0x28] sm:$0xe] }
  0x2d   :  { %v103_v25 = vrot.slane %v102_v10, 4  ;;  %v154_v31 = vrot.slane %v152_v20, 4  ;;  %v166_v32 = vshrl.u32 %v2096_v63, 16  ;;  %v169_v34 = vshll.u32 %v2096_v63, 16  ;;  %v387_v9 = vld [vmem:[#allocation2 + $0x30] sm:$0xe] }
  0x2e   :  { %1843 = vmatprep.mubr.msk.bf16.mxu1 %vm200_vm2, %v1671_v17  ;;  %v175_v35 = vshll.u32 %v2107_v16, 16  ;;  %v117_v37 = vrot.slane %v116_v26, 4  ;;  %v422_v39 = vrot.slane %v2087_v51, 5  ;;  %v157_v40 = vrot.slane %v155_v29, 5  ;;  %v388_v17 = vld [vmem:[#allocation2 + $0x38] sm:$0xe] }
  0x2f   :  { %v108_v36 = vsel %vm2064_vm3, %v103_v25, %v107_v6  ;;  %v163_v44 = vrot.slane %v161_v30, 5  ;;  %v168_v45 = vrot.slane %v166_v32, 4  ;;  %v171_v48 = vrot.slane %v169_v34, 5  ;;  %v669_v20 = vld [vmem:[#allocation2 + $0x8] sm:$0xf] }
  0x30   :  { %v1687_v49 = vrot.slane %v381_v23, 9  ;;  %v122_v52 = vsel %vm2064_vm3, %v117_v37, %v121_v19  ;;  %v158_v53 = vor.u32 %v157_v40, %v154_v31  ;;  %v177_v54 = vrot.slane %v175_v35, 5  ;;  %v671_v25 = vld [vmem:[#allocation2 + $0x10] sm:$0xf]  ;;  %v2161_v32 = vld [vmem:[#allocation2 + $0x14] sm:$0x1] }
  0x31   :  { %v1688_v55 = vrot.slane %v382_v24, 9  ;;  %v1670_v51 = vcombine.low %v108_v36, %v122_v52  ;;  %v172_v56 = vor.u32 %v171_v48, %v168_v45  ;;  %v1689_v59 = vrot.slane %v383_v42, 9  ;;  %v2158_v24 = vld [vmem:[#allocation2 + $0xc] sm:$0x1]  ;;  %v2171_v40 = vld [vmem:[#allocation4 + $0x30] sm:$0xff]  }
  0x32   :  { %v411_v57 = vsel %vm2121_vm6, %v1687_v49, %v410_v11  ;;  %v159_v5 = vrot.slane %v158_v53, 4  ;;  %v1690_v7 = vrot.slane %v384_v50, 9  ;;  %v1691_v8 = vrot.slane %v385_v61, 9  ;;  %v673_v50 = vld [vmem:[#allocation2 + $0x18] sm:$0xf] }
  0x33   :  { %v415_v6 = vsel %vm2121_vm6, %v1688_v55, %v414_v12  ;;  %1840 = vmatmul.mubr.msk.bf16.vlgmr.msra.gmra.mxu0 %vm200_vm2, %v1670_v51  ;;  %v173_v10 = vrot.slane %v172_v56, 4  ;;  %v419_v11 = vsel %vm2121_vm6, %v1689_v59, %v418_v15  ;;  %v1692_v14 = vrot.slane %v386_v62, 9  ;;  %v2148_v15 = vld [vmem:[#allocation4 + $0x18] sm:$0xff]   ;;  %v2181_v52 = vld [vmem:[#allocation2 + $0x1c] sm:$0x1] }
  0x34   :  { %v1695_v3 = vcombine.low %v411_v57, %v415_v6  ;;  %v164_v19 = vsel %vm2064_vm3, %v159_v5, %v163_v44  ;;  %1858 = vmatpush3.bf16.msra.mxu0 %v2071_v33  ;;  %v1678_v4 = vcombine.low %v2033_v1, %v2035_v2  ;;  %v423_v12 = vsel %vm2121_vm6, %v1690_v7, %v422_v39  ;;  %v675_v53 = vld [vmem:[#allocation2 + $0x20] sm:$0xf]  ;;  %v2184_v55 = vld [vmem:[#allocation2 + $0x24] sm:$0x1]  ;;  %v2189_v5 = vld [vmem:[#allocation4 + $0x28] sm:$0xff]  }
  0x35   :  { %v178_v23 = vsel %vm2064_vm3, %v173_v10, %v177_v54  ;;  %1877 = vmatprep.subr.bf16.mxu0 %v1939_v60  ;;  %v427_v33 = vsel %vm2121_vm6, %v1691_v8, %v426_v46  ;;  %v431_v1 = vsel %vm2121_vm6, %v1692_v14, %v430_v47  ;;  %v1693_v2 = vrot.slane %v387_v9, 9 }
  0x36   :  { %1859 = vmatprep.mubr.msk.bf16.mxu0 %vm200_vm2, %v1695_v3  ;;  %v1672_v26 = vcombine.low %v164_v19, %v178_v23  ;;  %v1696_v29 = vcombine.low %v419_v11, %v423_v12  ;;  %v434_v30 = vrot.slane %v2098_v0, 5  ;;  %v1694_v31 = vrot.slane %v388_v17, 9  ;;  %v677_v19 = vld [vmem:[#allocation2 + $0x28] sm:$0xf]  ;;  %v2200_v23 = vld [vmem:[#allocation2 + $0x2c] sm:$0x1] }
  0x37   :  { %v438_v21 = vrot.slane %v2107_v16, 5  ;;  %v686_v34 = vshrl.u32 %v669_v20, 16  ;;  %v689_v46 = vshll.u32 %v669_v20, 16  ;;  %v695_v22 = vshll.u32 %v2158_v24, 16 }
  0x38   :  { %1844 = vmatmul.mubr.msk.bf16.vlgmr.msra.gmra.mxu1 %vm200_vm2, %v1672_v26  ;;  %v1697_v47 = vcombine.low %v427_v33, %v431_v1  ;;  %v700_v35 = vshrl.u32 %v671_v25, 16  ;;  %v703_v36 = vshll.u32 %v671_v25, 16  ;;  %v709_v37 = vshll.u32 %v2161_v32, 16  ;;  %v679_v33 = vld [vmem:[#allocation2 + $0x30] sm:$0xf] }
  0x39   :  { %1848 = vmatpush3.bf16.msra.mxu1 %v2060_v27  ;;  %1849 = vmatprep.mubr.msk.bf16.mxu1 %vm200_vm2, %v1678_v4  ;;  %v1680_v0 = vcombine.low %v2049_v13, %v2051_v18  ;;  %v688_v39 = vrot.slane %v686_v34, 4  ;;  %v691_v16 = vrot.slane %v689_v46, 5  ;;  %v697_v42 = vrot.slane %v695_v22, 5  ;;  %v2202_v1 = vld [vmem:[#allocation2 + $0x34] sm:$0x1] }
  0x3a   :  { %1867 = vmatprep.subr.bf16.mxu1 %v2148_v15  ;;  %v702_v44 = vrot.slane %v700_v35, 4  ;;  %v705_v45 = vrot.slane %v703_v36, 5  ;;  %v711_v48 = vrot.slane %v709_v37, 5  ;;  %v1679_v49 = vcombine.low %v2074_v38, %v2076_v43 }
  0x3b   :  { %1860 = vmatmul.mubr.msk.bf16.vlgmr.msra.gmra.mxu0 %vm200_vm2, %v1696_v29  ;;  %v435_v27 = vsel %vm2121_vm6, %v1693_v2, %v434_v30  ;;  %v439_v13 = vsel %vm2121_vm6, %v1694_v31, %v438_v21  ;;  %v692_v18 = vor.u32 %v691_v16, %v688_v39  ;;  %v714_v38 = vshrl.u32 %v673_v50, 16 }
  0x3c   :  { %1878 = vmatpush3.bf16.msra.mxu0 %v1939_v60  ;;  %1863 = vmatprep.mubr.msk.bf16.mxu0 %vm200_vm2, %v1697_v47  ;;  %v706_v54 = vor.u32 %v705_v45, %v702_v44  ;;  %v717_v43 = vshll.u32 %v673_v50, 16  ;;  %v723_v51 = vshll.u32 %v2181_v52, 16  ;;  %v728_v57 = vshrl.u32 %v675_v53, 16  ;;  %v683_v44 = vld [vmem:[#allocation2 + $0x40] sm:$0xf] }
  0x3d   :  { %v693_v56 = vrot.slane %v692_v18, 4  ;;  %v731_v59 = vshll.u32 %v675_v53, 16  ;;  %v737_v61 = vshll.u32 %v2184_v55, 16  ;;  %1897 = vmatprep.subr.bf16.mxu0 %v2171_v40  ;;  %v716_v60 = vrot.slane %v714_v38, 4  ;;  %v2215_v45 = vld [vmem:[#allocation2 + $0x44] sm:$0x1] }
  0x3e   :  { %v707_v62 = vrot.slane %v706_v54, 4  ;;  %v719_v6 = vrot.slane %v717_v43, 5  ;;  %v1698_v7 = vcombine.low %v435_v27, %v439_v13  ;;  %v730_v9 = vrot.slane %v728_v57, 4  ;;  %v903_v38 = vld [vmem:[#allocation2 + $0x8] sm:$0xe]  ;;  %v2221_v57 = vld [vmem:[#allocation4 + $0x40] sm:$0xff]  }
  0x3f   :  { %v698_v8 = vsel %vm2064_vm3, %v693_v56, %v697_v42  ;;  %v733_v10 = vrot.slane %v731_v59, 5  ;;  %v725_v14 = vrot.slane %v723_v51, 5  ;;  %v739_v17 = vrot.slane %v737_v61, 5  ;;  %v2213_v42 = vld [vmem:[#allocation2 + $0x3c] sm:$0x1] }
  0x40   :  { %1850 = vmatmul.mubr.msk.bf16.vlgmr.msra.gmra.mxu1 %vm200_vm2, %v1679_v49  ;;  %v712_v3 = vsel %vm2064_vm3, %v707_v62, %v711_v48  ;;  %v720_v11 = vor.u32 %v719_v6, %v716_v60  ;;  %v1681_v4 = vcombine.low %v2093_v58, %v2096_v63  ;;  %v742_v25 = vshrl.u32 %v677_v19, 16  ;;  %v1942_v63 = vld [vmem:[#allocation2 + $0x8] ss:$8 sps:$4 sm:$0xff]   ;;  %v1944_v59 = vld [vmem:[#allocation2 + $0x18] ss:$8 sps:$4 sm:$0xff]  }
  0x41   :  { %1868 = vmatpush3.bf16.msra.mxu1 %v2148_v15  ;;  %1853 = vmatprep.mubr.msk.bf16.mxu1 %vm200_vm2, %v1680_v0  ;;  %v1713_v12 = vcombine.low %v698_v8, %v712_v3  ;;  %v734_v20 = vor.u32 %v733_v10, %v730_v9  ;;  %v745_v26 = vshll.u32 %v677_v19, 16  ;;  %v751_v29 = vshll.u32 %v2200_v23, 16  ;;  %v681_v0 = vld [vmem:[#allocation2 + $0x38] sm:$0xf]  ;;  %v904_v6 = vld [vmem:[#allocation2 + $0x10] sm:$0xe] }
  0x42   :  { %1887 = vmatprep.subr.bf16.mxu1 %v2189_v5  ;;  %v721_v2 = vrot.slane %v720_v11, 4  ;;  %v756_v30 = vshrl.u32 %v679_v33, 16  ;;  %v759_v31 = vshll.u32 %v679_v33, 16  ;;  %v765_v58 = vshll.u32 %v2202_v1, 16 }
  0x43   :  { %1864 = vmatmul.mubr.msk.bf16.gmra.mxu0 %vm200_vm2, %v1698_v7  ;;  %v735_v15 = vrot.slane %v734_v20, 4  ;;  %v744_v34 = vrot.slane %v742_v25, 4  ;;  %v747_v46 = vrot.slane %v745_v26, 5  ;;  %v753_v22 = vrot.slane %v751_v29, 5  ;;  %v1946_v7 = vld [vmem:[#allocation2 + $0x28] ss:$8 sps:$4 sm:$0xff]  }
  0x44   :  { %1879 = vmatprep.mubr.msk.bf16.mxu0 %vm200_vm2, %v1713_v12  ;;  %v726_v21 = vsel %vm2064_vm3, %v721_v2, %v725_v14  ;;  %v758_v35 = vrot.slane %v756_v30, 4  ;;  %v761_v36 = vrot.slane %v759_v31, 5  ;;  %v767_v37 = vrot.slane %v765_v58, 5  ;;  %v905_v12 = vld [vmem:[#allocation2 + $0x18] sm:$0xe] }
  0x45   :  { %v740_v47 = vsel %vm2064_vm3, %v735_v15, %v739_v17  ;;  %v748_v16 = vor.u32 %v747_v46, %v744_v34  ;;  %v770_v49 = vshrl.u32 %v681_v0, 16  ;;  %v773_v27 = vshll.u32 %v681_v0, 16  ;;  %v906_v25 = vld [vmem:[#allocation2 + $0x20] sm:$0xe]  ;;  %v1948_v31 = vld [vmem:[#allocation2 + $0x10] ss:$8 sps:$4 sm:$0xff]  }
  0x46   :  { %v1714_v39 = vcombine.low %v726_v21, %v740_v47  ;;  %v762_v48 = vor.u32 %v761_v36, %v758_v35  ;;  %v779_v13 = vshll.u32 %v2213_v42, 16  ;;  %v784_v50 = vshrl.u32 %v683_v44, 16  ;;  %v908_v21 = vld [vmem:[#allocation2 + $0x30] sm:$0xe]  ;;  %v910_v0 = vld [vmem:[#allocation2 + $0x40] sm:$0xe] }
  0x47   :  { %v749_v18 = vrot.slane %v748_v16, 4  ;;  %v787_v53 = vshll.u32 %v683_v44, 16  ;;  %v793_v54 = vshll.u32 %v2215_v45, 16  ;;  %v772_v51 = vrot.slane %v770_v49, 4 }
  0x48   :  { %1854 = vmatmul.mubr.msk.bf16.gmra.mxu1 %vm200_vm2, %v1681_v4  ;;  %v763_v43 = vrot.slane %v762_v48, 4  ;;  %v775_v56 = vrot.slane %v773_v27, 5  ;;  %v786_v62 = vrot.slane %v784_v50, 4  ;;  %v781_v10 = vrot.slane %v779_v13, 5  ;;  %v2230_v4 = vld [vmem:[#allocation4 + $0x38] sm:$0xff]  }
  0x49   :  { %1869 = vmatprep.mubr.msk.bf16.mxu1 %vm200_vm2, %v1942_v63  ;;  %v754_v61 = vsel %vm2064_vm3, %v749_v18, %v753_v22  ;;  %v789_v60 = vrot.slane %v787_v53, 5  ;;  %v795_v3 = vrot.slane %v793_v54, 5  ;;  %v1722_v17 = vrot.slane %v903_v38, 9  ;;  %v907_v63 = vld [vmem:[#allocation2 + $0x28] sm:$0xe] }
  0x4a   :  { %v768_v8 = vsel %vm2064_vm3, %v763_v43, %v767_v37  ;;  %v776_v9 = vor.u32 %v775_v56, %v772_v51  ;;  %v929_v19 = vrot.slane %v2158_v24, 5  ;;  %v1723_v33 = vrot.slane %v904_v6, 9  ;;  %v1947_v22 = vld [vmem:[#allocation2 + $0x38] ss:$8 sps:$4 sm:$0xff]   ;;  %v1188_v50 = vld [vmem:[#allocation2 + $0x10] sm:$0xf] }
  0x4b   :  { %1880 = vmatmul.mubr.msk.bf16.vlgmr.msra.gmra.mxu0 %vm200_vm2, %v1714_v39  ;;  %v1715_v11 = vcombine.low %v754_v61, %v768_v8  ;;  %v790_v14 = vor.u32 %v789_v60, %v786_v62  ;;  %v933_v2 = vrot.slane %v2161_v32, 5  ;;  %v1724_v26 = vrot.slane %v905_v12, 9  ;;  %v909_v37 = vld [vmem:[#allocation2 + $0x38] sm:$0xe]  ;;  %v1950_v13 = vld [vmem:[#allocation2 + $0x20] ss:$8 sps:$4 sm:$0xff]  }
  0x4c   :  { %1898 = vmatpush3.bf16.msra.mxu0 %v2171_v40  ;;  %v777_v20 = vrot.slane %v776_v9, 4  ;;  %v937_v40 = vrot.slane %v2181_v52, 5  ;;  %v1725_v15 = vrot.slane %v906_v25, 9  ;;  %v941_v30 = vrot.slane %v2184_v55, 5  ;;  %v1952_v53 = vld [vmem:[#allocation2 + $0x30] ss:$8 sps:$4 sm:$0xff]  }
  0x4d   :  { %1917 = vmatprep.subr.bf16.mxu0 %v2221_v57  ;;  %1883 = vmatprep.mubr.msk.bf16.mxu0 %vm200_vm2, %v1715_v11  ;;  %v791_v29 = vrot.slane %v790_v14, 4  ;;  %v930_v58 = vsel %vm2121_vm6, %v1722_v17, %v929_v19  ;;  %v934_v55 = vsel %vm2121_vm6, %v1723_v33, %v933_v2  ;;  %v1726_v34 = vrot.slane %v907_v63, 9  ;;  %v1190_v38 = vld [vmem:[#allocation2 + $0x18] sm:$0xf]  ;;  %v1191_v43 = vld [vmem:[#allocation2 + $0x1c] sm:$0x1] }
  0x4e   :  { %v782_v24 = vsel %vm2064_vm3, %v777_v20, %v781_v10  ;;  %v945_v46 = vrot.slane %v2200_v23, 5  ;;  %v2252_v47 = vsel %vm2121_vm6, %v1724_v26, %v937_v40  ;;  %v2256_v35 = vsel %vm2121_vm6, %v1725_v15, %v941_v30  ;;  %v1422_v6 = vld [vmem:[#allocation2 + $0x10] sm:$0xe]  ;;  %v1423_v10 = vld [vmem:[#allocation2 + $0x18] sm:$0xe] }
  0x4f   :  { %v796_v32 = vsel %vm2064_vm3, %v791_v29, %v795_v3  ;;  %v949_v36 = vrot.slane %v2202_v1, 5  ;;  %v1728_v39 = vrot.slane %v909_v37, 9  ;;  %v953_v16 = vrot.slane %v2213_v42, 5  ;;  %v1189_v42 = vld [vmem:[#allocation2 + $0x14] sm:$0x1] }
  0x50   :  { %1870 = vmatmul.mubr.msk.bf16.vlgmr.msra.gmra.mxu1 %vm200_vm2, %v1944_v59  ;;  %v1716_v52 = vcombine.low %v782_v24, %v796_v32  ;;  %v2262_v23 = vsel %vm2121_vm6, %v1726_v34, %v945_v46  ;;  %v957_v44 = vrot.slane %v2215_v45, 5  ;;  %v1729_v1 = vrot.slane %v910_v0, 9  ;;  %v1192_v12 = vld [vmem:[#allocation2 + $0x20] sm:$0xf]  ;;  %v1193_v26 = vld [vmem:[#allocation2 + $0x24] sm:$0x1] }
  0x51   :  { %1888 = vmatpush3.bf16.msra.mxu1 %v2189_v5  ;;  %1873 = vmatprep.mubr.msk.bf16.mxu1 %vm200_vm2, %v1946_v7  ;;  %v1727_v5 = vrot.slane %v908_v21, 9  ;;  %v1730_v49 = vcombine.low %v930_v58, %v934_v55  ;;  %v1731_v27 = vcombine.low %v2252_v47, %v2256_v35  ;;  %v2275_v18 = vsel %vm2121_vm6, %v1728_v39, %v953_v16  ;;  %v1194_v15 = vld [vmem:[#allocation2 + $0x28] sm:$0xf]  ;;  %v1195_v30 = vld [vmem:[#allocation2 + $0x2c] sm:$0x1] }
  0x52   :  { %1907 = vmatprep.subr.bf16.mxu1 %v2230_v4  ;;  %v2281_v54 = vsel %vm2121_vm6, %v1729_v1, %v957_v44  ;;  %v1205_v51 = vshrl.u32 %v1188_v50, 16  ;;  %v1208_v56 = vshll.u32 %v1188_v50, 16  ;;  %v1214_v61 = vshll.u32 %v1189_v42, 16  ;;  %v1196_v39 = vld [vmem:[#allocation2 + $0x30] sm:$0xf] }
  0x53   :  { %1884 = vmatmul.mubr.msk.bf16.gmra.mxu0 %vm200_vm2, %v1716_v52  ;;  %v2269_v48 = vsel %vm2121_vm6, %v1727_v5, %v949_v36  ;;  %v1733_v59 = vcombine.low %v2275_v18, %v2281_v54  ;;  %v1219_v62 = vshrl.u32 %v1190_v38, 16  ;;  %v1222_v60 = vshll.u32 %v1190_v38, 16  ;;  %v1424_v52 = vld [vmem:[#allocation2 + $0x20] sm:$0xe]  ;;  %v1425_v5 = vld [vmem:[#allocation2 + $0x28] sm:$0xe] }
  0x54   :  { %1899 = vmatprep.mubr.msk.bf16.mxu0 %vm200_vm2, %v1948_v31  ;;  %v1732_v45 = vcombine.low %v2262_v23, %v2269_v48  ;;  %v1207_v7 = vrot.slane %v1205_v51, 4  ;;  %v1210_v8 = vrot.slane %v1208_v56, 5  ;;  %v1228_v9 = vshll.u32 %v1191_v43, 16  ;;  %v1953_v16 = vld [vmem:[#allocation2 + $0x40] ss:$8 sps:$4 sm:$0xff]  }
  0x55   :  { %v1757_v3 = vrot.slane %v1422_v6, 9  ;;  %v1216_v11 = vrot.slane %v1214_v61, 5  ;;  %v1221_v14 = vrot.slane %v1219_v62, 4  ;;  %v1224_v17 = vrot.slane %v1222_v60, 5  ;;  %v1197_v50 = vld [vmem:[#allocation2 + $0x34] sm:$0x1] }
  0x56   :  { %v1448_v19 = vrot.slane %v1189_v42, 5  ;;  %v1211_v20 = vor.u32 %v1210_v8, %v1207_v7  ;;  %v1230_v33 = vrot.slane %v1228_v9, 5  ;;  %v1758_v2 = vrot.slane %v1423_v10, 9  ;;  %v1198_v51 = vld [vmem:[#allocation2 + $0x38] sm:$0xf] }
  0x57   :  { %v1452_v25 = vrot.slane %v1191_v43, 5  ;;  %v1225_v29 = vor.u32 %v1224_v17, %v1221_v14  ;;  %v1233_v24 = vshrl.u32 %v1192_v12, 16  ;;  %v1236_v31 = vshll.u32 %v1192_v12, 16  ;;  %v1199_v35 = vld [vmem:[#allocation2 + $0x3c] sm:$0x1] }
  0x58   :  { %1874 = vmatmul.mubr.msk.bf16.gmra.mxu1 %vm200_vm2, %v1947_v22  ;;  %v1449_v40 = vsel %vm2121_vm6, %v1757_v3, %v1448_v19  ;;  %v1212_v32 = vrot.slane %v1211_v20, 4  ;;  %v1242_v63 = vshll.u32 %v1193_v26, 16  ;;  %v1247_v21 = vshrl.u32 %v1194_v15, 16  ;;  %v1426_v8 = vld [vmem:[#allocation2 + $0x30] sm:$0xe] }
  0x59   :  { %1889 = vmatprep.mubr.msk.bf16.mxu1 %vm200_vm2, %v1730_v49  ;;  %v1453_v58 = vsel %vm2121_vm6, %v1758_v2, %v1452_v25  ;;  %v1226_v55 = vrot.slane %v1225_v29, 4  ;;  %v1235_v46 = vrot.slane %v1233_v24, 4  ;;  %v1238_v22 = vrot.slane %v1236_v31, 5  ;;  %v1427_v9 = vld [vmem:[#allocation2 + $0x38] sm:$0xe] }
  0x5a   :  { %v1765_v34 = vcombine.low %v1449_v40, %v1453_v58  ;;  %v1217_v36 = vsel %vm2064_vm3, %v1212_v32, %v1216_v11  ;;  %v1244_v37 = vrot.slane %v1242_v63, 5  ;;  %v1249_v0 = vrot.slane %v1247_v21, 4  ;;  %v1201_v40 = vld [vmem:[#allocation2 + $0x44] sm:$0x1] }
  0x5b   :  { %1900 = vmatmul.mubr.msk.bf16.vlgmr.msra.gmra.mxu0 %vm200_vm2, %v1950_v13  ;;  %v1231_v44 = vsel %vm2064_vm3, %v1226_v55, %v1230_v33  ;;  %v1239_v1 = vor.u32 %v1238_v22, %v1235_v46  ;;  %v1256_v49 = vshll.u32 %v1195_v30, 16  ;;  %v1759_v13 = vrot.slane %v1424_v52, 9  ;;  %v1200_v33 = vld [vmem:[#allocation2 + $0x40] sm:$0xf]  ;;  %v1203_v46 = vld [vmem:[#allocation2 + $0x4c] sm:$0x1] }
  0x5c   :  { %1918 = vmatpush3.bf16.msra.mxu0 %v2221_v57  ;;  %1903 = vmatprep.mubr.msk.bf16.mxu0 %vm200_vm2, %v1952_v53  ;;  %v1250_v57 = vshll.u32 %v1194_v15, 16  ;;  %v1748_v42 = vcombine.low %v1217_v36, %v1231_v44  ;;  %v1456_v38 = vrot.slane %v1193_v26, 5  ;;  %v1760_v43 = vrot.slane %v1425_v5, 9  ;;  %v1202_v15 = vld [vmem:[#allocation2 + $0x48] sm:$0xf] }
  0x5d   :  { %v1240_v56 = vrot.slane %v1239_v1, 4  ;;  %v1258_v61 = vrot.slane %v1256_v49, 5  ;;  %v1460_v62 = vrot.slane %v1195_v30, 5  ;;  %v1261_v60 = vshrl.u32 %v1196_v39, 16  ;;  %v1428_v36 = vld [vmem:[#allocation2 + $0x40] sm:$0xe] }
  0x5e   :  { %v1252_v53 = vrot.slane %v1250_v57, 5  ;;  %v1457_v47 = vsel %vm2121_vm6, %v1759_v13, %v1456_v38  ;;  %v1270_v7 = vshll.u32 %v1197_v50, 16  ;;  %v1278_v19 = vshll.u32 %v1198_v51, 16 }
  0x5f   :  { %v1461_v23 = vsel %vm2121_vm6, %v1760_v43, %v1460_v62  ;;  %v1263_v48 = vrot.slane %v1261_v60, 4  ;;  %v1284_v12 = vshll.u32 %v1199_v35, 16  ;;  %v1761_v20 = vrot.slane %v1426_v8, 9 }
  0x60   :  { %1890 = vmatmul.mubr.msk.bf16.vlgmr.msra.gmra.mxu1 %vm200_vm2, %v1731_v27  ;;  %v1253_v6 = vor.u32 %v1252_v53, %v1249_v0  ;;  %v1264_v27 = vshll.u32 %v1196_v39, 16  ;;  %v1766_v3 = vcombine.low %v1457_v47, %v1461_v23  ;;  %v1272_v14 = vrot.slane %v1270_v7, 5  ;;  %v1429_v0 = vld [vmem:[#allocation2 + $0x48] sm:$0xe] }
  0x61   :  { %1908 = vmatpush3.bf16.msra.mxu1 %v2230_v4  ;;  %1893 = vmatprep.mubr.msk.bf16.mxu1 %vm200_vm2, %v1732_v45  ;;  %v1245_v4 = vsel %vm2064_vm3, %v1240_v56, %v1244_v37  ;;  %v1275_v45 = vshrl.u32 %v1198_v51, 16  ;;  %v1464_v26 = vrot.slane %v1197_v50, 5  ;;  %v1762_v29 = vrot.slane %v1427_v9, 9 }
  0x62   :  { %v1254_v10 = vrot.slane %v1253_v6, 4  ;;  %v1266_v11 = vrot.slane %v1264_v27, 5  ;;  %v1280_v24 = vrot.slane %v1278_v19, 5  ;;  %v1286_v31 = vrot.slane %v1284_v12, 5 }
  0x63   :  { %1904 = vmatmul.mubr.msk.bf16.gmra.mxu0 %vm200_vm2, %v1953_v16  ;;  %v1277_v17 = vrot.slane %v1275_v45, 4  ;;  %v1468_v32 = vrot.slane %v1199_v35, 5  ;;  %v1465_v63 = vsel %vm2121_vm6, %v1761_v20, %v1464_v26  ;;  %v1289_v21 = vshrl.u32 %v1200_v33, 16 }
  0x64   :  { %1919 = vmatprep.mubr.msk.bf16.mxu0 %vm200_vm2, %v1765_v34  ;;  %v1259_v2 = vsel %vm2064_vm3, %v1254_v10, %v1258_v61  ;;  %v1267_v25 = vor.u32 %v1266_v11, %v1263_v48  ;;  %v1292_v52 = vshll.u32 %v1200_v33, 16  ;;  %v1298_v22 = vshll.u32 %v1201_v40, 16 }
  0x65   :  { %v1749_v30 = vcombine.low %v1245_v4, %v1259_v2  ;;  %v1281_v55 = vor.u32 %v1280_v24, %v1277_v17  ;;  %v1469_v34 = vsel %vm2121_vm6, %v1762_v29, %v1468_v32  ;;  %v1303_v5 = vshrl.u32 %v1202_v15, 16 }
  0x66   :  { %v1268_v58 = vrot.slane %v1267_v25, 4  ;;  %v1767_v54 = vcombine.low %v1465_v63, %v1469_v34  ;;  %v1294_v37 = vrot.slane %v1292_v52, 5  ;;  %v1300_v39 = vrot.slane %v1298_v22, 5 }
  0x67   :  { %v1282_v57 = vrot.slane %v1281_v55, 4  ;;  %v1305_v16 = vrot.slane %v1303_v5, 4  ;;  %v1306_v44 = vshll.u32 %v1202_v15, 16  ;;  %v1312_v49 = vshll.u32 %v1203_v46, 16 }
  0x68   :  { %1894 = vmatmul.mubr.msk.bf16.gmra.mxu1 %vm200_vm2, %v1733_v59  ;;  %v1273_v18 = vsel %vm2064_vm3, %v1268_v58, %v1272_v14  ;;  %v1291_v59 = vrot.slane %v1289_v21, 4  ;;  %v1763_v13 = vrot.slane %v1428_v36, 9  ;;  %v1472_v50 = vrot.slane %v1201_v40, 5 }
  0x69   :  { %1909 = vmatprep.mubr.msk.bf16.mxu1 %vm200_vm2, %v1748_v42  ;;  %v1287_v42 = vsel %vm2064_vm3, %v1282_v57, %v1286_v31  ;;  %v1308_v53 = vrot.slane %v1306_v44, 5  ;;  %v1764_v38 = vrot.slane %v1429_v0, 9  ;;  %v1476_v43 = vrot.slane %v1203_v46, 5 }
  0x6a   :  { %v1295_v1 = vor.u32 %v1294_v37, %v1291_v59  ;;  %v1750_v51 = vcombine.low %v1273_v18, %v1287_v42  ;;  %v1473_v61 = vsel %vm2121_vm6, %v1763_v13, %v1472_v50  ;;  %v1314_v60 = vrot.slane %v1312_v49, 5 }
  0x6b   :  { %1920 = vmatmul.mubr.msk.bf16.vlgmr.msra.gmra.mxu0 %vm200_vm2, %v1766_v3  ;;  %v1309_v62 = vor.u32 %v1308_v53, %v1305_v16  ;;  %v1477_v6 = vsel %vm2121_vm6, %v1764_v38, %v1476_v43  ;;  %vm1654_vm7 = vcmask 257024  }
  0x6c   :  { %1923 = vmatprep.mubr.msk.bf16.mxu0 %vm200_vm2, %v1767_v54  ;;  %v1296_v56 = vrot.slane %v1295_v1, 4  ;;  %v1768_v47 = vcombine.low %v1473_v61, %v1477_v6 }
  0x6d   :  { %v1310_v27 = vrot.slane %v1309_v62, 4 }
  0x6e   :  { %v1301_v35 = vsel %vm2064_vm3, %v1296_v56, %v1300_v39 }
  0x6f   :  { %v1315_v7 = vsel %vm2064_vm3, %v1310_v27, %v1314_v60 }
  0x70   :  { %1910 = vmatmul.mubr.msk.bf16.vlgmr.msra.gmra.mxu1 %vm200_vm2, %v1749_v30  ;;  %v1751_v8 = vcombine.low %v1301_v35, %v1315_v7 }
  0x71   :  { %1913 = vmatprep.mubr.msk.bf16.mxu1 %vm200_vm2, %v1750_v51 }
  0x73   :  { %1924 = vmatmul.mubr.msk.bf16.gmra.mxu0 %vm200_vm2, %v1768_v47 }
  0x78   :  { %1914 = vmatmul.mubr.msk.bf16.gmra.mxu1 %vm200_vm2, %v1751_v8 }
  0xf3   :  { %v1841_v4 = vpop.f32.mrf.mxu0 }
  0xf5   :  { %v247_v41 = vpop.f32.mrf.mxu0 }
  0xf7   :  { %v1842_v23 = vpop.f32.mrf.mxu0 }
  0xf8   :  { %v1845_v48 = vpop.f32.mrf.mxu1 }
  0xf9   :  { %v250_v45 = vpop.f32.mrf.mxu0 }
  0xfa   :  { %v263_v9 = vpop.f32.mrf.mxu1 }
  0xfb   :  { %v1861_v10 = vpop.f32.mrf.mxu0 }
  0xfc   :  { %v1846_v3 = vpop.f32.mrf.mxu1 }
  0xfd   :  { %v507_v11 = vpop.f32.mrf.mxu0 }
  0xfe   :  { %v2344_v14 = vpop.f32.mrf.mxu1 }
  0xff   :  { %v1862_v17 = vpop.f32.mrf.mxu0 }
 0x100   :  { %v1851_v19 = vpop.f32.mrf.mxu1 }
 0x101   :  { %v510_v28 = vpop.f32.mrf.mxu0  ;;  %v359_v39 = vadd.f32 %v1851_v19, %v1841_v4 }
 0x102   :  { %v350_v12 = vpop.f32.mrf.mxu1 }
 0x103   :  { %v1865_v20 = vpop.f32.mrf.mxu0  ;;  %v351_v1 = vadd.f32 %v350_v12, %v247_v41  ;;  %v540_v50 = vadd.f32 %v1861_v10, %v359_v39 }
 0x104   :  { %v1852_v33 = vpop.f32.mrf.mxu1 }
 0x105   :  { %v2346_v2 = vpop.f32.mrf.mxu0  ;;  %v362_v42 = vadd.f32 %v1852_v33, %v1842_v23  ;;  %v538_v43 = vadd.f32 %v507_v11, %v351_v1 }
 0x106   :  { %v353_v25 = vpop.f32.mrf.mxu1 }
 0x107   :  { %v1866_v26 = vpop.f32.mrf.mxu0  ;;  %v354_v51 = vadd.f32 %v353_v25, %v250_v45  ;;  %v541_v60 = vadd.f32 %v1862_v17, %v362_v42 }
 0x108   :  { %v1855_v29 = vpop.f32.mrf.mxu1 }
 0x109   :  { %v2348_v40 = vpop.f32.mrf.mxu0  ;;  %v375_v35 = vadd.f32 %v1855_v29, %v1845_v48  ;;  %v539_v7 = vadd.f32 %v510_v28, %v354_v51 }
 0x10a   :  { %v366_v15 = vpop.f32.mrf.mxu1 }
 0x10b   :  { %v1881_v30 = vpop.f32.mrf.mxu0  ;;  %v367_v23 = vadd.f32 %v366_v15, %v263_v9  ;;  %v544_v25 = vadd.f32 %v1865_v20, %v375_v35 }
 0x10c   :  { %v1856_v24 = vpop.f32.mrf.mxu1 }
 0x10d   :  { %v864_v31 = vpop.f32.mrf.mxu0  ;;  %v378_v10 = vadd.f32 %v1856_v24, %v1846_v3  ;;  %v542_v28 = vadd.f32 %v2346_v2, %v367_v23  ;;  %v2373_v2 = vld [vmem:[%s2437_s2] ss:$0 sm:$0xff] }
 0x10e   :  { %v369_v32 = vpop.f32.mrf.mxu1 }
 0x10f   :  { %v1882_v58 = vpop.f32.mrf.mxu0  ;;  %v370_v17 = vadd.f32 %v369_v32, %v2344_v14  ;;  %v545_v29 = vadd.f32 %v1866_v26, %v378_v10 }
 0x110   :  { %v1871_v63 = vpop.f32.mrf.mxu1 }
 0x111   :  { %v867_v21 = vpop.f32.mrf.mxu0  ;;  %v663_v56 = vadd.f32 %v1871_v63, %v540_v50  ;;  %v543_v24 = vadd.f32 %v2348_v40, %v370_v17 }
 0x112   :  { %v630_v52 = vpop.f32.mrf.mxu1 }
 0x113   :  { %v2350_v55 = vpop.f32.mrf.mxu0  ;;  %v661_v6 = vadd.f32 %v630_v52, %v538_v43  ;;  %v897_v8 = vadd.f32 %v1881_v30, %v663_v56 }
 0x114   :  { %v1872_v34 = vpop.f32.mrf.mxu1 }
 0x115   :  { %v2352_v46 = vpop.f32.mrf.mxu0  ;;  %v664_v4 = vadd.f32 %v1872_v34, %v541_v60  ;;  %v895_v11 = vadd.f32 %v864_v31, %v661_v6 }
 0x116   :  { %v633_v22 = vpop.f32.mrf.mxu1 }
 0x117   :  { %v2354_v5 = vpop.f32.mrf.mxu0  ;;  %v662_v45 = vadd.f32 %v633_v22, %v539_v7  ;;  %v898_v52 = vadd.f32 %v1882_v58, %v664_v4 }
 0x118   :  { %v1875_v36 = vpop.f32.mrf.mxu1 }
 0x119   :  { %v2356_v18 = vpop.f32.mrf.mxu0  ;;  %v667_v30 = vadd.f32 %v1875_v36, %v544_v25  ;;  %v896_v1 = vadd.f32 %v867_v21, %v662_v45 }
 0x11a   :  { %v646_v54 = vpop.f32.mrf.mxu1 }
 0x11b   :  { %v1901_v59 = vpop.f32.mrf.mxu0  ;;  %v665_v31 = vadd.f32 %v646_v54, %v542_v28 }
 0x11c   :  { %v1876_v37 = vpop.f32.mrf.mxu1 }
 0x11d   :  { %v1149_v0 = vpop.f32.mrf.mxu0  ;;  %v668_v22 = vadd.f32 %v1876_v37, %v545_v29  ;;  %v899_v40 = vadd.f32 %v2352_v46, %v665_v31 }
 0x11e   :  { %v649_v57 = vpop.f32.mrf.mxu1 }
 0x11f   :  { %v1902_v16 = vpop.f32.mrf.mxu0  ;;  %v666_v50 = vadd.f32 %v649_v57, %v543_v24  ;;  %v902_v54 = vadd.f32 %v2354_v5, %v668_v22 }
 0x120   :  { %v1891_v44 = vpop.f32.mrf.mxu1 }
 0x121   :  { %v1152_v49 = vpop.f32.mrf.mxu0  ;;  %v1059_v12 = vadd.f32 %v1891_v44, %v897_v8 }
 0x122   :  { %v1026_v13 = vpop.f32.mrf.mxu1 }
 0x123   :  { %v2358_v53 = vpop.f32.mrf.mxu0  ;;  %v1057_v39 = vadd.f32 %v1026_v13, %v895_v11  ;;  %v1182_v9 = vadd.f32 %v1901_v59, %v1059_v12  ;;  %v901_v13 = vadd.f32 %v2350_v55, %v667_v30 }
 0x124   :  { %v1892_v38 = vpop.f32.mrf.mxu1 }
 0x125   :  { %v2360_v61 = vpop.f32.mrf.mxu0  ;;  %v1060_v3 = vadd.f32 %v1892_v38, %v898_v52  ;;  %v1180_v44 = vadd.f32 %v1149_v0, %v1057_v39  ;;  %v2380_v0 = vld [vmem:[%s2438_s3] ss:$0 sm:$0xff] }
 0x126   :  { %v1029_v62 = vpop.f32.mrf.mxu1 }
 0x127   :  { %v2362_v47 = vpop.f32.mrf.mxu0  ;;  %v1058_v14 = vadd.f32 %v1029_v62, %v896_v1  ;;  %v1183_v21 = vadd.f32 %v1902_v16, %v1060_v3  ;;  %v900_v16 = vadd.f32 %v2356_v18, %v666_v50 }
 0x128   :  { %v1895_v27 = vpop.f32.mrf.mxu1 }
 0x129   :  { %v2364_v41 = vpop.f32.mrf.mxu0  ;;  %v1063_v37 = vadd.f32 %v1895_v27, %v901_v13  ;;  %v1181_v42 = vadd.f32 %v1152_v49, %v1058_v14 }
 0x12a   :  { %v1042_v19 = vpop.f32.mrf.mxu1 }
 0x12b   :  { %v1921_v33 = vpop.f32.mrf.mxu0  ;;  %v1061_v56 = vadd.f32 %v1042_v19, %v899_v40  ;;  %v1186_v27 = vadd.f32 %v2358_v53, %v1063_v37 }
 0x12c   :  { %v1896_v63 = vpop.f32.mrf.mxu1 }
 0x12d   :  { %v1545_v48 = vpop.f32.mrf.mxu0  ;;  %v1064_v62 = vadd.f32 %v1896_v63, %v902_v54  ;;  %v1184_v19 = vadd.f32 %v2360_v61, %v1061_v56 }
 0x12e   :  { %v1045_v34 = vpop.f32.mrf.mxu1 }
 0x12f   :  { %v1922_v15 = vpop.f32.mrf.mxu0  ;;  %v1062_v7 = vadd.f32 %v1045_v34, %v900_v16  ;;  %v1187_v11 = vadd.f32 %v2362_v47, %v1064_v62 }
 0x130   :  { %v1911_v20 = vpop.f32.mrf.mxu1 }
 0x131   :  { %v1416_v32 = vadd.f32 %v1911_v20, %v1182_v9  ;;  %v1548_v58 = vpop.f32.mrf.mxu0  ;;  %v1185_v63 = vadd.f32 %v2364_v41, %v1062_v7 }
 0x132   :  { %v1383_v26 = vpop.f32.mrf.mxu1 }
 0x133   :  { %v1578_v36 = vadd.f32 %v1921_v33, %v1416_v32  ;;  %v1414_v59 = vadd.f32 %v1383_v26, %v1180_v44  ;;  %v1925_v57 = vpop.f32.mrf.mxu0 }
 0x134   :  { %v1912_v55 = vpop.f32.mrf.mxu1 }
 0x135   :  { %v1593_v38 = vmul.f32 %v2373_v2, %v1578_v36  ;;  %v1576_v43 = vadd.f32 %v1545_v48, %v1414_v59  ;;  %v1417_v51 = vadd.f32 %v1912_v55, %v1183_v21  ;;  %v1561_v49 = vpop.f32.mrf.mxu0 }
 0x136   :  { %v1386_v46 = vpop.f32.mrf.mxu1 }
 0x137   :  { %v1608_v5 = vadd.f32 %v2380_v0, %v1593_v38  ;;  %v1591_v60 = vmul.f32 %v2373_v2, %v1576_v43  ;;  %v1579_v6 = vadd.f32 %v1922_v15, %v1417_v51  ;;  %v1415_v35 = vadd.f32 %v1386_v46, %v1181_v42  ;;  %v1926_v28 = vpop.f32.mrf.mxu0 }
 0x138   :  { %v1915_v8 = vpop.f32.mrf.mxu1 }
 0x139   :  { %v1616_v4 = vmax.f32 %v1608_v5, 0.0  ;;  %v1606_v23 = vadd.f32 %v2380_v0, %v1591_v60  ;;  %v1594_v10 = vmul.f32 %v2373_v2, %v1579_v6  ;;  %v1577_v18 = vadd.f32 %v1548_v58, %v1415_v35  ;;  %v1564_v20 = vpop.f32.mrf.mxu0 }
 0x13a   :  { %v1420_v45 = vadd.f32 %v1915_v8, %v1186_v27  ;;  %v1399_v12 = vpop.f32.mrf.mxu1 }
 0x13b   :  { %v1786_v33 = vpack.c.bf16 %v1616_v4, %v1616_v4  ;;  %v1614_v25 = vmax.f32 %v1606_v23, 0.0  ;;  %v1609_v53 = vadd.f32 %v2380_v0, %v1594_v10  ;;  %v1592_v17 = vmul.f32 %v2373_v2, %v1577_v18 }
 0x13c   :  { %v1582_v52 = vadd.f32 %v1925_v57, %v1420_v45  ;;  %v1418_v39 = vadd.f32 %v1399_v12, %v1184_v19  ;;  %v1916_v48 = vpop.f32.mrf.mxu1 }
 0x13d   :  { %1657 = vst.msk [vmem:[%s2439_s4 + $0x8] sm:$0xf] %vm1654_vm7, %v1786_v33  ;;  %v1784_v61 = vpack.c.bf16 %v1614_v25, %v1614_v25  ;;  %v1617_v47 = vmax.f32 %v1609_v53, 0.0  ;;  %v1607_v29 = vadd.f32 %v2380_v0, %v1592_v17  ;;  %v1421_v30 = vadd.f32 %v1916_v48, %v1187_v11 }
 0x13e   :  { %v1597_v34 = vmul.f32 %v2373_v2, %v1582_v52  ;;  %v1580_v1 = vadd.f32 %v1561_v49, %v1418_v39  ;;  %v1402_v9 = vpop.f32.mrf.mxu1 }
 0x13f   :  { %1655 = vst.msk [vmem:[%s2439_s4] sm:$0xf] %vm1654_vm7, %v1784_v61  ;;  %v1787_v41 = vpack.c.bf16 %v1617_v47, %v1617_v47  ;;  %v1615_v3 = vmax.f32 %v1607_v29, 0.0  ;;  %v1583_v15 = vadd.f32 %v1926_v28, %v1421_v30  ;;  %v1419_v24 = vadd.f32 %v1402_v9, %v1185_v63 }
 0x140   :  { %v1612_v31 = vadd.f32 %v2380_v0, %v1597_v34  ;;  %v1595_v22 = vmul.f32 %v2373_v2, %v1580_v1 }
 0x141   :  { %1658 = vst.msk [vmem:[%s2439_s4 + $0xc] sm:$0xf] %vm1654_vm7, %v1787_v41  ;;  %v1785_v44 = vpack.c.bf16 %v1615_v3, %v1615_v3  ;;  %v1598_v14 = vmul.f32 %v2373_v2, %v1583_v15  ;;  %v1581_v32 = vadd.f32 %v1564_v20, %v1419_v24 }
 0x142   :  { %v1620_v58 = vmax.f32 %v1612_v31, 0.0  ;;  %v1610_v13 = vadd.f32 %v2380_v0, %v1595_v22 }
 0x143   :  { %1656 = vst.msk [vmem:[%s2439_s4 + $0x4] sm:$0xf] %vm1654_vm7, %v1785_v44  ;;  %v1613_v50 = vadd.f32 %v2380_v0, %v1598_v14  ;;  %v1596_v26 = vmul.f32 %v2373_v2, %v1581_v32 }
 0x144   :  { %v1790_v21 = vpack.c.bf16 %v1620_v58, %v1620_v58  ;;  %v1618_v36 = vmax.f32 %v1610_v13, 0.0 }
 0x145   :  { %v1621_v59 = vmax.f32 %v1613_v50, 0.0  ;;  %v1611_v40 = vadd.f32 %v2380_v0, %v1596_v26 }
 0x146   :  { %1661 = vst.msk [vmem:[%s2439_s4 + $0x18] sm:$0xf] %vm1654_vm7, %v1790_v21  ;;  %v1788_v54 = vpack.c.bf16 %v1618_v36, %v1618_v36 }
 0x147   :  { %v1791_v37 = vpack.c.bf16 %v1621_v59, %v1621_v59  ;;  %v1619_v55 = vmax.f32 %v1611_v40, 0.0 }
 0x148   :  { %1659 = vst.msk [vmem:[%s2439_s4 + $0x10] sm:$0xf] %vm1654_vm7, %v1788_v54 }
 0x149   :  { %1662 = vst.msk [vmem:[%s2439_s4 + $0x1c] sm:$0xf] %vm1654_vm7, %v1791_v37  ;;  %v1789_v2 = vpack.c.bf16 %v1619_v55, %v1619_v55 }
 0x14b   :  { %1660 = vst.msk [vmem:[%s2439_s4 + $0x14] sm:$0xf] %vm1654_vm7, %v1789_v2 }
 0x14c   :  { %1667 = vsyncpa [#allocation3], 1 }
 0x14d   :  { %1668 = vsyncpa [#allocation5], 1 }

</bundles_post_ra>
